<compile_context>
chip_gen: v7x
topology: tpu7x:2x2x1
jax: 0.10.0
libtpu: 0.0.40
codegen_flags: <defaults>
</compile_context>

<pallas_src>
import functools

import jax
import jax.numpy as jnp
import numpy as np
from jax import lax
from jax.experimental import pallas as pl
from jax.experimental.pallas import tpu as pltpu


def _ce_onehot_kernel(*refs, has_weight, needs_mask, tiles_per_part,
                      tile_n, n_total):
    if has_weight:
        logits_ref, tgt_ref, w_ref, loss_ref, acc_ref = refs
    else:
        logits_ref, tgt_ref, loss_ref, acc_ref = refs
        w_ref = None

    p = pl.program_id(0)          # partition axis ("parallel": 2 cores on v7x)
    i = pl.program_id(1)          # batch-tile axis within the partition

    @pl.when(i == 0)
    def _init():
        acc_ref[...] = jnp.zeros_like(acc_ref)

    x = logits_ref[...].astype(jnp.float32)      # (tile_n, C) logits
    t = tgt_ref[...].astype(jnp.float32)         # (tile_n, C) soft targets

    # sum_c -t*(x - m - lse)  ==  (m + lse) * sum_c(t) - sum_c(t*x)
    m = jnp.max(x, axis=1, keepdims=True)                          # row max
    lse = jnp.log(jnp.sum(jnp.exp(x - m), axis=1, keepdims=True))  # logsumexp
    sum_t = jnp.sum(t, axis=1, keepdims=True)
    sum_tx = jnp.sum(t * x, axis=1, keepdims=True)
    per_sample = (m + lse) * sum_t - sum_tx                        # (tile_n, 1)

    if has_weight:
        w = w_ref[...].astype(jnp.float32)                         # (1, C)
        factor = jnp.sum(w * t, axis=1, keepdims=True)
        per_sample = factor * per_sample

    if needs_mask:
        # Rows past the true batch (ragged last tile / fully-padded tiles that
        # were clamped onto the last real tile) contribute exactly 0.  The
        # select also blocks any NaN/Inf from garbage rows.
        row0 = (p * tiles_per_part + i) * tile_n
        row = row0 + lax.broadcasted_iota(jnp.int32, (tile_n, 1), 0)
        per_sample = jnp.where(row < n_total, per_sample, 0.0)

    # tiny per-step reduce into a scalar scratch; hidden under the block DMA
    acc_ref[...] += jnp.sum(per_sample, keepdims=True)

    @pl.when(i == pl.num_programs(1) - 1)
    def _finalize():
        loss_ref[...] = acc_ref[...]


def _sublane_multiple(dtype):
    # native tile: (8,128) f32, (16,128) bf16, (32,128) int8/fp8
    return max(8, 32 // jnp.dtype(dtype).itemsize)


def _vmem_capacity_bytes():
    try:
        return int(pltpu.get_tpu_info().vmem_capacity_bytes)
    except Exception:
        return 64 * 1024 * 1024          # conservative (v7x per-core) fallback


def _default_partitions():
    # v7x has 2 TensorCores per chip -> split batch tiles across them.
    try:
        kind = jax.devices()[0].device_kind.lower()
    except Exception:
        return 1
    return 2 if ("v7" in kind or "tpu7" in kind) else 1


def _pick_tile_n(n, c, sub, cap):
    # Size by bytes: target f32 working-tile of min(8 MiB, VMEM/16).
    target_f32_tile_bytes = min(8 * 1024 * 1024, cap // 16)
    rows = (target_f32_tile_bytes // max(1, c * 4)) // sub * sub
    rows = max(sub, rows)
    n_pad = ((n + sub - 1) // sub) * sub
    return int(min(rows, n_pad))


def _vmem_limit_bytes(tile_n, c, isz_l, isz_t, cap):
    f32_tile = tile_n * c * 4
    need = (2 * tile_n * c * (isz_l + isz_t)   # 2 inputs x 2 pipeline buffers
            + 5 * f32_tile                     # f32 intermediates (x-m, exp, t*x, w*t, headroom)
            + (4 << 20))                       # weight row / scalars / slack
    need = max(need, 32 << 20)
    return int(min(need, (cap // 10) * 9))


def cross_entropy_one_hot(output, target, weight=None, reduction="mean",
                          tile_n=None, num_partitions=None):
    """output: (N, C) logits; target: (N, C) soft/one-hot targets;
    weight: (C,) or None; reduction in {'mean', 'sum'} ('mean' divides by N,
    matching the PyTorch module's torch.mean)."""
    if reduction not in ("mean", "sum"):
        raise NotImplementedError("reduction method unknown")
    N, C = output.shape
    has_weight = weight is not None

    isz_l = jnp.dtype(output.dtype).itemsize
    isz_t = jnp.dtype(target.dtype).itemsize
    sub = int(np.lcm(_sublane_multiple(output.dtype),
                     _sublane_multiple(target.dtype)))
    cap = _vmem_capacity_bytes()

    if tile_n is None:
        tile_n = _pick_tile_n(N, C, sub, cap)
    tile_n = max(sub, ((int(tile_n) + sub - 1) // sub) * sub)

    tiles_total = int(pl.cdiv(N, tile_n))
    P = _default_partitions() if num_partitions is None else int(num_partitions)
    P = max(1, min(P, tiles_total))
    tiles_per_part = int(pl.cdiv(tiles_total, P))
    needs_mask = (P * tiles_per_part * tile_n) != N

    def in_map(p, i):
        # Clamp fully-padded trailing tiles onto the last real tile; their rows
        # (>= N) are masked to zero inside the kernel.
        return (jnp.minimum(p * tiles_per_part + i, tiles_total - 1), 0)

    in_specs = [
        pl.BlockSpec((tile_n, C), in_map),      # logits
        pl.BlockSpec((tile_n, C), in_map),      # targets
    ]
    args = [output, target]
    if has_weight:
        w_row = jnp.asarray(weight, jnp.float32).reshape(1, C)
        # grid-invariant index map -> fetched once, stays resident
        in_specs.append(pl.BlockSpec((1, C), lambda p, i: (0, 0)))
        args.append(w_row)

    kernel = functools.partial(
        _ce_onehot_kernel,
        has_weight=has_weight, needs_mask=needs_mask,
        tiles_per_part=tiles_per_part, tile_n=int(tile_n), n_total=N)

    partials = pl.pallas_call(
        kernel,
        out_shape=jax.ShapeDtypeStruct((P, 1, 1), jnp.float32),
        grid_spec=pltpu.PrefetchScalarGridSpec(
            num_scalar_prefetch=0,
            grid=(P, tiles_per_part),
            in_specs=in_specs,
            out_specs=pl.BlockSpec((1, 1, 1), lambda p, i: (p, 0, 0)),
            scratch_shapes=[pltpu.VMEM((1, 1, 1), jnp.float32)],
        ),
        compiler_params=pltpu.CompilerParams(
            dimension_semantics=("parallel", "arbitrary"),
            vmem_limit_bytes=_vmem_limit_bytes(tile_n, C, isz_l, isz_t, cap),
        ),
    )(*args)

    loss = jnp.sum(partials)                  # combine per-core partial losses
    if reduction == "mean":
        loss = loss / N
    return loss


def _reference(output, target, weight, reduction):
    logp = jax.nn.log_softmax(output.astype(jnp.float32), axis=1)
    per = jnp.sum(-target * logp, axis=1)
    factor = jnp.sum(weight[None, :] * target, axis=1) if weight is not None else 1.0
    v = factor * per
    return jnp.mean(v) if reduction == "mean" else jnp.sum(v)


if __name__ == "__main__":
    key = jax.random.PRNGKey(0)
    keys = jax.random.split(key, 10)

    cases = []   # (logits, target, weight, reduction, tile_n, num_partitions, tol)

    # 1) weighted, mean, defaults (single tile, auto partitions).
    N, C = 8, 128
    logits = jax.random.normal(keys[0], (N, C), dtype=jnp.float32)
    target = jax.nn.one_hot(jax.random.randint(keys[1], (N,), 0, C), C,
                            dtype=jnp.float32)
    weight = 0.5 + jnp.arange(C, dtype=jnp.float32) / C
    cases.append((logits, target, weight, "mean", None, None, 1e-4))

    # 2) unweighted, sum, multi-tile + ragged batch (mask path).
    N, C = 12, 256
    logits = jax.random.normal(keys[2], (N, C), dtype=jnp.float32)
    target = jax.nn.softmax(
        jax.random.normal(keys[3], (N, C), dtype=jnp.float32), axis=1)
    cases.append((logits, target, None, "sum", 8, None, 1e-4))

    # 3) weighted, mean, unaligned C, forced 2 partitions (dual-core layout).
    N, C = 16, 48
    logits = jax.random.normal(keys[4], (N, C), dtype=jnp.float32)
    target = jax.nn.one_hot(jax.random.randint(keys[5], (N,), 0, C), C,
                            dtype=jnp.float32)
    weight = 0.5 + jnp.arange(C, dtype=jnp.float32) / C
    cases.append((logits, target, weight, "mean", 8, 2, 1e-4))

    # 4) unweighted, sum, ragged + fully-padded (clamped) tile, 2 partitions.
    N, C = 20, 40
    logits = jax.random.normal(keys[6], (N, C), dtype=jnp.float32)
    target = jax.nn.softmax(
        jax.random.normal(keys[7], (N, C), dtype=jnp.float32), axis=1)
    cases.append((logits, target, None, "sum", 8, 2, 1e-4))

    # 5) bf16 inputs (16-row sublane packing), weighted, mean, defaults.
    N, C = 32, 128
    logits = jax.random.normal(keys[8], (N, C), dtype=jnp.float32).astype(jnp.bfloat16)
    target = jax.nn.one_hot(jax.random.randint(keys[9], (N,), 0, C), C,
                            dtype=jnp.bfloat16)
    weight = 0.5 + jnp.arange(C, dtype=jnp.float32) / C
    cases.append((logits, target, weight, "mean", None, None, 1e-3))

    results = []
    for logits, target, weight, reduction, tile, parts, _ in cases:
        results.append(cross_entropy_one_hot(
            logits, target, weight=weight, reduction=reduction,
            tile_n=tile, num_partitions=parts))
    jax.block_until_ready(results)

    for (logits, target, weight, reduction, _, _, tol), got in zip(cases, results):
        want = _reference(logits, target, weight, reduction)
        np.testing.assert_allclose(np.asarray(got), np.asarray(want),
                                   rtol=tol, atol=tol)

    print("KERNEL_OK")
</pallas_src>

<mosaic_0001>
module attributes {stable_mosaic.version = 11 : i64} {
  func.func @_ce_onehot_kernel(%arg0: i32, %arg1: i32, %arg2: memref<8x128xf32, #tpu.memory_space<vmem>>, %arg3: memref<8x128xf32, #tpu.memory_space<vmem>>, %arg4: memref<1x128xf32, #tpu.memory_space<vmem>>, %arg5: memref<1x1x1xf32, #tpu.memory_space<vmem>>, %arg6: memref<1x1x1xf32, #tpu.memory_space<vmem>>) attributes {dimension_semantics = [#tpu.dimension_semantics<parallel>, #tpu.dimension_semantics<arbitrary>], iteration_bounds = array<i64: 1, 1>, scalar_prefetch = 0 : i64, scratch_operands = 1 : i64, tpu.core_type = #tpu.core_type<tc>, window_params = [{transform_indices = @transform_0, window_bounds = array<i64: 8, 128>}, {transform_indices = @transform_1, window_bounds = array<i64: 8, 128>}, {pipeline_mode = #tpu.pipeline_mode<synchronous>, transform_indices = @transform_2, window_bounds = array<i64: 1, 128>}, {transform_indices = @transform_3, window_bounds = array<i64: 1, 1, 1>}]} {
    %c0_i32 = arith.constant 0 : i32
    %0 = arith.cmpi eq, %arg1, %c0_i32 : i32
    %1 = arith.extui %0 : i1 to i32
    %c0_i32_0 = arith.constant 0 : i32
    %2 = arith.cmpi ne, %1, %c0_i32_0 : i32
    scf.if %2 {
      %cst_19 = arith.constant 0.000000e+00 : f32
      %39 = vector.broadcast %cst_19 : f32 to vector<1x1x1xf32>
      %c0_20 = arith.constant 0 : index
      %c0_21 = arith.constant 0 : index
      %c0_22 = arith.constant 0 : index
      %40 = vector.load %arg6[%c0_20, %c0_21, %c0_22] : memref<1x1x1xf32, #tpu.memory_space<vmem>>, vector<1x1x1xf32>
      tpu.vector_store %arg6[%c0_20, %c0_21, %c0_22], %39 {strides = array<i32>} : memref<1x1x1xf32, #tpu.memory_space<vmem>>, vector<1x1x1xf32>,
    } else {
    }
    %c0 = arith.constant 0 : index
    %c0_1 = arith.constant 0 : index
    %3 = vector.load %arg2[%c0, %c0_1] : memref<8x128xf32, #tpu.memory_space<vmem>>, vector<8x128xf32>
    %c0_2 = arith.constant 0 : index
    %c0_3 = arith.constant 0 : index
    %4 = vector.load %arg3[%c0_2, %c0_3] : memref<8x128xf32, #tpu.memory_space<vmem>>, vector<8x128xf32>
    %cst = arith.constant dense<0xFF800000> : vector<8xf32>
    %5 = vector.multi_reduction <maximumf>, %3, %cst [1] : vector<8x128xf32> to vector<8xf32>
    %6 = vector.shape_cast %5 : vector<8xf32> to vector<8x1xf32>
    %7 = vector.broadcast %6 : vector<8x1xf32> to vector<8x128xf32>
    %8 = arith.subf %3, %7 : vector<8x128xf32>
    %9 = math.exp %8 : vector<8x128xf32>
    %cst_4 = arith.constant dense<0.000000e+00> : vector<8xf32>
    %10 = vector.multi_reduction <add>, %9, %cst_4 [1] : vector<8x128xf32> to vector<8xf32>
    %11 = vector.shape_cast %10 : vector<8xf32> to vector<8x1xf32>
    %12 = math.log %11 : vector<8x1xf32>
    %cst_5 = arith.constant dense<0.000000e+00> : vector<8xf32>
    %13 = vector.multi_reduction <add>, %4, %cst_5 [1] : vector<8x128xf32> to vector<8xf32>
    %14 = vector.shape_cast %13 : vector<8xf32> to vector<8x1xf32>
    %15 = arith.mulf %4, %3 : vector<8x128xf32>
    %cst_6 = arith.constant dense<0.000000e+00> : vector<8xf32>
    %16 = vector.multi_reduction <add>, %15, %cst_6 [1] : vector<8x128xf32> to vector<8xf32>
    %17 = vector.shape_cast %16 : vector<8xf32> to vector<8x1xf32>
    %18 = arith.addf %6, %12 : vector<8x1xf32>
    %19 = arith.mulf %18, %14 : vector<8x1xf32>
    %20 = arith.subf %19, %17 : vector<8x1xf32>
    %c0_7 = arith.constant 0 : index
    %c0_8 = arith.constant 0 : index
    %21 = vector.load %arg4[%c0_7, %c0_8] : memref<1x128xf32, #tpu.memory_space<vmem>>, vector<1x128xf32>
    %22 = vector.broadcast %21 : vector<1x128xf32> to vector<8x128xf32>
    %23 = arith.mulf %22, %4 : vector<8x128xf32>
    %cst_9 = arith.constant dense<0.000000e+00> : vector<8xf32>
    %24 = vector.multi_reduction <add>, %23, %cst_9 [1] : vector<8x128xf32> to vector<8xf32>
    %25 = vector.shape_cast %24 : vector<8xf32> to vector<8x1xf32>
    %26 = arith.mulf %25, %20 : vector<8x1xf32>
    %c0_10 = arith.constant 0 : index
    %c0_11 = arith.constant 0 : index
    %c0_12 = arith.constant 0 : index
    %27 = vector.load %arg6[%c0_10, %c0_11, %c0_12] : memref<1x1x1xf32, #tpu.memory_space<vmem>>, vector<1x1x1xf32>
    %28 = vector.shape_cast %26 : vector<8x1xf32> to vector<1x8x1xf32>
    %cst_13 = arith.constant dense<0.000000e+00> : vector<1xf32>
    %29 = vector.multi_reduction <add>, %28, %cst_13 [1, 2] : vector<1x8x1xf32> to vector<1xf32>
    %30 = vector.shape_cast %29 : vector<1xf32> to vector<1x1x1xf32>
    %31 = vector.extract %30[0, 0, 0] : f32 from vector<1x1x1xf32>
    %32 = vector.broadcast %31 : f32 to vector<1x1xf32>
    %33 = vector.shape_cast %32 : vector<1x1xf32> to vector<1x1x1xf32>
    %34 = arith.addf %27, %33 : vector<1x1x1xf32>
    %c0_14 = arith.constant 0 : index
    %c0_15 = arith.constant 0 : index
    %c0_16 = arith.constant 0 : index
    %35 = vector.load %arg6[%c0_14, %c0_15, %c0_16] : memref<1x1x1xf32, #tpu.memory_space<vmem>>, vector<1x1x1xf32>
    tpu.vector_store %arg6[%c0_14, %c0_15, %c0_16], %34 {strides = array<i32>} : memref<1x1x1xf32, #tpu.memory_space<vmem>>, vector<1x1x1xf32>,
    %c0_i32_17 = arith.constant 0 : i32
    %36 = arith.cmpi eq, %arg1, %c0_i32_17 : i32
    %37 = arith.extui %36 : i1 to i32
    %c0_i32_18 = arith.constant 0 : i32
    %38 = arith.cmpi ne, %37, %c0_i32_18 : i32
    scf.if %38 {
      %c0_19 = arith.constant 0 : index
      %c0_20 = arith.constant 0 : index
      %c0_21 = arith.constant 0 : index
      %39 = vector.load %arg6[%c0_19, %c0_20, %c0_21] : memref<1x1x1xf32, #tpu.memory_space<vmem>>, vector<1x1x1xf32>
      %c0_22 = arith.constant 0 : index
      %c0_23 = arith.constant 0 : index
      %c0_24 = arith.constant 0 : index
      %40 = vector.load %arg5[%c0_22, %c0_23, %c0_24] : memref<1x1x1xf32, #tpu.memory_space<vmem>>, vector<1x1x1xf32>
      tpu.vector_store %arg5[%c0_22, %c0_23, %c0_24], %39 {strides = array<i32>} : memref<1x1x1xf32, #tpu.memory_space<vmem>>, vector<1x1x1xf32>,
    } else {
    }
    return
  }
  func.func @transform_0(%arg0: i32, %arg1: i32) -> (i32, i32) {
    %c1_i32 = arith.constant 1 : i32
    %0 = arith.muli %arg0, %c1_i32 : i32
    %1 = arith.addi %0, %arg1 : i32
    %c0_i32 = arith.constant 0 : i32
    %2 = arith.minsi %1, %c0_i32 : i32
    %c0_i32_0 = arith.constant 0 : i32
    %c0_i32_1 = arith.constant 0 : i32
    return %2, %c0_i32_0 : i32, i32
  }
  func.func @transform_1(%arg0: i32, %arg1: i32) -> (i32, i32) {
    %c1_i32 = arith.constant 1 : i32
    %0 = arith.muli %arg0, %c1_i32 : i32
    %1 = arith.addi %0, %arg1 : i32
    %c0_i32 = arith.constant 0 : i32
    %2 = arith.minsi %1, %c0_i32 : i32
    %c0_i32_0 = arith.constant 0 : i32
    %c0_i32_1 = arith.constant 0 : i32
    return %2, %c0_i32_0 : i32, i32
  }
  func.func @transform_2(%arg0: i32, %arg1: i32) -> (i32, i32) {
    %c0_i32 = arith.constant 0 : i32
    %c0_i32_0 = arith.constant 0 : i32
    %c0_i32_1 = arith.constant 0 : i32
    return %c0_i32, %c0_i32_0 : i32, i32
  }
  func.func @transform_3(%arg0: i32, %arg1: i32) -> (i32, i32, i32) {
    %c0_i32 = arith.constant 0 : i32
    %c0_i32_0 = arith.constant 0 : i32
    %c0_i32_1 = arith.constant 0 : i32
    return %arg0, %c0_i32, %c0_i32_0 : i32, i32, i32
  }
}

</mosaic_0001>

<bundles_post_ra>
// kernel: tpu_custom_call.1
= control target key start
LH: loop header
LB: loop body
LE: loop exit
PB: predicated region body
PF: predicated region fallthrough
CT: control target
= control target key end

     0   :  { %8 = vsyncpa [#allocation4], 0  ;;  %s281_s0 = inlined_call_operand.hbm [shape: f32[8,128], index: 0, kind: input, shape index: {}]   ;;  %s282_s1 = inlined_call_operand.hbm [shape: f32[8,128], index: 1, kind: input, shape index: {}]   ;;  %s283_s2 = inlined_call_operand.vmem [shape: f32[1,128], index: 2, kind: input, shape index: {}]   ;;  %s284_s3 = inlined_call_operand.hbm [shape: f32[1,1,1], index: 3, kind: output, shape index: {}]  }
   0x1   :  { %9 = vsyncpa [#allocation7], 0 }
   0x2   :  { %10 = vsyncpa [#allocation5], 0  ;;  %s215_s12 = smov [#allocation3]   ;;  %s216_s14 = smov [#allocation6]  }
   0x3   :  { %s22_s13 = sshll.u32 %s215_s12, 4  ;;  %s37_s15 = sshll.u32 %s216_s14, 4  ;;  %s23_s13 = int_to_ptr.vmem [resolvable:$true] %s22_s13  ;;  %s38_s15 = int_to_ptr.vmem [resolvable:$true] %s37_s15 }
   0x4   :  { %s143_s18 = scalar_lea.hbm %s281_s0, 128 }
   0x5   :  { %p144_p0 = scmp.ne.s32.totalorder %s281_s0, %s143_s18  ;;  %p147_p1 = scmp.lt.u32.totalorder %s143_s18, %s281_s0 }
   0x7   :  { %p149_p2 = pnand %p147_p1, %p144_p0 }
   0x9   :  { %152 = shalt.err (!%p149_p2)
}
   0xa   :  { %s153_s23 = scalar_lea.vmem %s23_s13, 128  ;;  %p158_p4 = scmp.lt.s32.totalorder %s23_s13, %s23_s13 }
   0xb   :  { %p154_p3 = scmp.ne.s32.totalorder %s23_s13, %s153_s23  ;;  %p159_p5 = scmp.lt.s32.totalorder %s153_s23, %s153_s23 }
   0xd   :  { %p160_p6 = por %p159_p5, %p158_p4 }
   0xf   :  { %p161_p7 = pnand %p160_p6, %p154_p3 }
  0x11   :  { %164 = shalt.err (!%p161_p7)
}
  0x12   :  { %25 = dma.hbm_to_vmem [thread:$0]  %s281_s0, 128, %s23_s13, [#allocation4]  }
  0x13   :  { %s165_s28 = scalar_lea.hbm %s282_s1, 128 }
  0x14   :  { %p166_p8 = scmp.ne.s32.totalorder %s282_s1, %s165_s28  ;;  %p169_p9 = scmp.lt.u32.totalorder %s165_s28, %s282_s1 }
  0x16   :  { %p171_p10 = pnand %p169_p9, %p166_p8 }
  0x18   :  { %174 = shalt.err (!%p171_p10)
}
  0x19   :  { %s175_s6 = scalar_lea.vmem %s38_s15, 128  ;;  %p180_p12 = scmp.lt.s32.totalorder %s38_s15, %s38_s15 }
  0x1a   :  { %p176_p11 = scmp.ne.s32.totalorder %s38_s15, %s175_s6  ;;  %p181_p13 = scmp.lt.s32.totalorder %s175_s6, %s175_s6 }
  0x1c   :  { %p182_p0 = por %p181_p13, %p180_p12 }
  0x1e   :  { %p183_p1 = pnand %p182_p0, %p176_p11 }
  0x20   :  { %186 = shalt.err (!%p183_p1)
}
  0x21   :  { %40 = dma.hbm_to_vmem [thread:$0]  %s282_s1, 128, %s38_s15, [#allocation7]  }
  0x22   :  { %209 = dma.done.wait [#allocation4], 128  }
  0x23   :  { %210 = vsyncadd [#allocation4], 4294967168 }
  0x24   :  { %211 = dma.done.wait [#allocation7], 128  }
  0x25   :  { %212 = vsyncadd [#allocation7], 4294967168  ;;  %v61_v0 = vld [vmem:[#allocation3] sm:$0xff]  ;;  %v62_v1 = vld [vmem:[#allocation6] sm:$0xff]  ;;  %vm92_vm0 = vcmask 7168   ;;  %vm59_vm1 = vcmask 0  }
  0x26   :  { %63 = vmax.xlane.f32.xlu0 %v61_v0  ;;  %72 = vadd.xlane.f32.xlu1 %v62_v1  ;;  %v74_v2 = vmul.f32 %v62_v1, %v61_v0  ;;  %v132_v6 = vld [vmem:[%s283_s2] ss:$0 sm:$0xff]  ;;  %v217_v20 = vmov 0.0   ;;  %s218_s2 = smov [#allocation8]  }
  0x27   :  { %v87_v8 = vmul.f32 %v132_v6, %v62_v1  ;;  %60 = vst.msk [vmem:[#allocation2] sm:$0x1] %vm59_vm1, %v217_v20  ;;  %s118_s10 = sshll.u32 %s218_s2, 4  ;;  %s119_s10 = int_to_ptr.vmem [resolvable:$true] %s118_s10 }
  0x28   :  { %s187_s11 = scalar_lea.vmem %s119_s10, 16  ;;  %s191_s12 = scalar_lea.vmem %s119_s10, 32 }
  0x29   :  { %p188_p2 = scmp.ne.s32.totalorder %s119_s10, %s187_s11  ;;  %p192_p3 = scmp.lt.s32.totalorder %s119_s10, %s119_s10 }
  0x2a   :  { %75 = vadd.xlane.f32.xlu1 %v74_v2  ;;  %p193_p4 = scmp.lt.s32.totalorder %s191_s12, %s187_s11 }
  0x2c   :  { %p194_p5 = por %p193_p4, %p192_p3 }
  0x2e   :  { %v91_v28 = vld [vmem:[#allocation2] sm:$0x1]  ;;  %p195_p6 = pnand %p194_p5, %p188_p2 }
  0xb3   :  { %v64_v3 = vpop.xlane.xlu0 %63  ;;  %v73_v10 = vpop.xlane.xlu1 %72 }
  0xb4   :  { %v65_v4 = vsub.f32 %v61_v0, %v64_v3 }
  0xb6   :  { %v66_v5 = vmul.f32 1.442695, %v65_v4 }
  0xb7   :  { %v76_v14 = vpop.xlane.xlu1 %75 }
  0xb8   :  { %139 = vpow2.f32 %v66_v5 }
  0xc2   :  { %v140_v7 = vpop.eup %139 }
  0xc3   :  { %68 = vadd.xlane.f32.xlu0 %v140_v7 }
  0xc7   :  { %88 = vadd.xlane.f32.xlu0 %v87_v8 }
 0x150   :  { %v69_v9 = vpop.xlane.xlu0 %68 }
 0x151   :  { %141 = vlog2.f32 %v69_v9 }
 0x154   :  { %v89_v16 = vpop.xlane.xlu0 %88 }
 0x15b   :  { %v142_v11 = vpop.eup %141 }
 0x15c   :  { %v71_v12 = vmul.f32 0.6931472, %v142_v11 }
 0x15e   :  { %v77_v13 = vadd.f32 %v71_v12, %v64_v3 }
 0x160   :  { %v78_v15 = vmul.f32 %v77_v13, %v73_v10 }
 0x162   :  { %v79_v17 = vsub.f32 %v78_v15, %v76_v14 }
 0x164   :  { %v90_v18 = vmul.f32 %v89_v16, %v79_v17 }
 0x166   :  { %v93_v19 = vsel %vm92_vm0, %v90_v18, 0.0 }
 0x167   :  { %94 = vadd.xlane.f32.xlu1 %v93_v19 }
 0x1f4   :  { %v95_v21 = vpop.xlane.xlu1 %94 }
 0x1f5   :  { %v96_v22 = vrot.slane %v95_v21, 4 }
 0x1f7   :  { %v97_v23 = vadd.f32 %v96_v22, %v95_v21 }
 0x1f9   :  { %v98_v24 = vrot.slane %v97_v23, 2 }
 0x1fb   :  { %v99_v25 = vadd.f32 %v98_v24, %v97_v23 }
 0x1fd   :  { %v100_v26 = vrot.slane %v99_v25, 1 }
 0x1ff   :  { %v101_v27 = vadd.f32 %v100_v26, %v99_v25 }
 0x201   :  { %133 = vpush %v101_v27 }
 0x232   :  { %s134_s1 = spop %133 }
 0x233   :  { %v103_v29 = vstv %s134_s1 }
 0x234   :  { %v104_v30 = vadd.f32 %v103_v29, %v91_v28 }
 0x236   :  { %106 = vst.msk [vmem:[#allocation2] sm:$0x1] %vm59_vm1, %v104_v30 }
 0x23d   :  { %v110_v31 = vld [vmem:[#allocation2] sm:$0x1] }
 0x23e   :  { %111 = vst.msk [vmem:[#allocation8] sm:$0x1] %vm59_vm1, %v110_v31 }
 0x23f   :  { %198 = shalt.err (!%p195_p6)
}
 0x240   :  { %s199_s15 = scalar_lea.hbm %s284_s3, 16 }
 0x241   :  { %p200_p7 = scmp.ne.s32.totalorder %s284_s3, %s199_s15  ;;  %p203_p8 = scmp.lt.u32.totalorder %s199_s15, %s284_s3 }
 0x243   :  { %p205_p9 = pnand %p203_p8, %p200_p7 }
 0x245   :  { %208 = shalt.err (!%p205_p9)
}
 0x246   :  { %121 = dma.vmem_to_hbm [thread:$0]  %s119_s10, 16, %s284_s3, [#allocation5]  }
 0x247   :  { %213 = dma.done.wait [#allocation5], 16  }
 0x248   :  { %214 = vsyncadd [#allocation5], 4294967280 }
 0x249   :  { %125 = vsyncpa [#allocation4], 1 }
 0x24a   :  { %126 = vsyncpa [#allocation7], 1 }
 0x24b   :  { %127 = vsyncpa [#allocation5], 1 }

</bundles_post_ra>
